<compile_context>
chip_gen: v7x
topology: tpu7x:2x2x1
jax: 0.10.0
libtpu: 0.0.40
codegen_flags: <defaults>
</compile_context>

<pallas_src>
import functools

import jax
import jax.numpy as jnp
from jax import lax
from jax.experimental import pallas as pl
from jax.experimental.pallas import tpu as pltpu

EPS = 1e-5  # PyTorch GroupNorm default eps


def _group_norm_relu(y, p_ref, gmat_ref):
    """Conv-bias + GroupNorm (biased var) + ReLU on a (C, HW) slab.

    p_ref is (3, C, 1): rows = [conv bias, gamma, beta].  gmat_ref is the
    (C, C) group-averaging matrix (1/(HW*Cg) for channels in the same group),
    so per-group stats come from one lane reduction plus one tiny matmul and
    arrive already broadcast back to channels (2 MXU ops per GN instead of 4).
    """
    b = p_ref[0]        # (C, 1)
    gamma = p_ref[1]    # (C, 1)
    beta = p_ref[2]     # (C, 1)
    y = y + b
    s = jnp.sum(y, axis=1, keepdims=True)          # (C, 1)
    ss = jnp.sum(y * y, axis=1, keepdims=True)     # (C, 1)
    mean = jnp.dot(gmat_ref[...], s, preferred_element_type=jnp.float32)   # (C, 1)
    msq = jnp.dot(gmat_ref[...], ss, preferred_element_type=jnp.float32)   # (C, 1)
    # NOTE: single-pass E[y^2]-E[y]^2 variance; fine at GN-normalized scales.
    var = msq - mean * mean
    inv = lax.rsqrt(var + EPS)
    return jnp.maximum((y - mean) * (inv * gamma) + beta, 0.0)


def _bottleneck_kernel(x_ref, w1_ref, w2_ref, w3_ref,
                       p1_ref, p2_ref, p3_ref,
                       gm_ref, go_ref, mask_ref,
                       o_ref, *, W):
    HW = x_ref.shape[2]

    x = x_ref[0]                                   # (Cin, HW) f32 residual slab

    # ---- conv1 (1x1) + GN + ReLU: (Cm,Cin)@(Cin,HW) bf16 on the MXU ---------
    y = jnp.dot(w1_ref[...], x.astype(jnp.bfloat16),
                preferred_element_type=jnp.float32)
    y = _group_norm_relu(y, p1_ref, gm_ref)

    # ---- conv2 (3x3, pad=1, stride=1) as ONE K=9*Cm im2col matmul -----------
    # Spatial taps are lane rotations of the flattened HW axis (XLU rolls, no
    # VMEM pad scratch); out-of-image taps are zeroed by a precomputed 0/1 mask.
    taps = []
    for dh in range(3):
        for dw in range(3):
            s_off = (dh - 1) * W + (dw - 1)        # flat source offset
            if s_off == 0:
                taps.append(y)
            else:
                taps.append(pltpu.roll(y, (-s_off) % HW, axis=1))
    patches = jnp.concatenate(taps, axis=0) * mask_ref[...]       # (9*Cm, HW)
    y = jnp.dot(w2_ref[...], patches.astype(jnp.bfloat16),
                preferred_element_type=jnp.float32)
    y = _group_norm_relu(y, p2_ref, gm_ref)

    # ---- conv3 (1x1) + GN + ReLU --------------------------------------------
    y = jnp.dot(w3_ref[...], y.astype(jnp.bfloat16),
                preferred_element_type=jnp.float32)
    y = _group_norm_relu(y, p3_ref, go_ref)

    # ---- residual + ReLU (downsample is None for stride=1) ------------------
    o_ref[0] = jnp.maximum(x + y, 0.0)


def bottleneck_block(x_nchw, params):
    """Fused BottleneckBlock forward.  x_nchw: (N, Cin, H, W) float32."""
    N, Cin, H, W = x_nchw.shape
    HW = H * W
    w1, w2, w3 = params['w1'], params['w2'], params['w3']
    Cm = w1.shape[0]
    Cout = w3.shape[0]
    G = params['num_groups']
    assert Cin == Cout, "stride=1 residual path requires in_planes == planes"

    # NCHW -> (N, C, HW): free reshape, already the kernel's transposed layout.
    x = x_nchw.reshape(N, Cin, HW).astype(jnp.float32)

    # MXU operands in bf16 (accumulation stays f32 inside the kernel).
    w1t = w1.astype(jnp.bfloat16)                                         # (Cm, Cin)
    w2t = jnp.transpose(w2, (0, 2, 3, 1)).reshape(Cm, 9 * Cm).astype(jnp.bfloat16)
    w3t = w3.astype(jnp.bfloat16)                                         # (Cout, Cm)

    # Per-stage (bias, gamma, beta) packed into a single operand each.
    pack = lambda b, g, be: jnp.stack([b, g, be], axis=0).reshape(3, -1, 1).astype(jnp.float32)
    p1 = pack(params['b1'], params['g1'], params['be1'])                  # (3, Cm, 1)
    p2 = pack(params['b2'], params['g2'], params['be2'])                  # (3, Cm, 1)
    p3 = pack(params['b3'], params['g3'], params['be3'])                  # (3, Cout, 1)

    # Group-averaging matrices (broadcast-back folded in): 1/(HW*Cg) if same group.
    def gmat(C):
        Cg = C // G
        same = (jnp.arange(C)[:, None] // Cg) == (jnp.arange(C)[None, :] // Cg)
        return same.astype(jnp.float32) / float(HW * Cg)
    gm = gmat(Cm)                                                         # (Cm, Cm)
    go = gmat(Cout)                                                       # (Cout, Cout)

    # 0/1 validity masks for the nine 3x3 taps on the flattened spatial axis,
    # replicated over the Cm input channels of each tap block.
    pos = jnp.arange(HW)
    hh, ww = pos // W, pos % W
    blocks = []
    for dh in range(3):
        for dw in range(3):
            valid = ((hh + dh - 1 >= 0) & (hh + dh - 1 < H) &
                     (ww + dw - 1 >= 0) & (ww + dw - 1 < W))
            blocks.append(jnp.broadcast_to(valid.astype(jnp.float32), (Cm, HW)))
    tap_mask = jnp.concatenate(blocks, axis=0)                            # (9*Cm, HW)

    grid_spec = pltpu.PrefetchScalarGridSpec(
        num_scalar_prefetch=0,
        # One sample per step: keeps both v7x TensorCores busy (parallel axis);
        # on single-TC v5e/v6e the one extra step costs only ~0.35 us.
        grid=(N,),
        in_specs=[
            pl.BlockSpec((1, Cin, HW), lambda n: (n, 0, 0)),
            pl.BlockSpec((Cm, Cin), lambda n: (0, 0)),
            pl.BlockSpec((Cm, 9 * Cm), lambda n: (0, 0)),
            pl.BlockSpec((Cout, Cm), lambda n: (0, 0)),
            pl.BlockSpec((3, Cm, 1), lambda n: (0, 0, 0)),
            pl.BlockSpec((3, Cm, 1), lambda n: (0, 0, 0)),
            pl.BlockSpec((3, Cout, 1), lambda n: (0, 0, 0)),
            pl.BlockSpec((Cm, Cm), lambda n: (0, 0)),
            pl.BlockSpec((Cout, Cout), lambda n: (0, 0)),
            pl.BlockSpec((9 * Cm, HW), lambda n: (0, 0)),
        ],
        out_specs=pl.BlockSpec((1, Cout, HW), lambda n: (n, 0, 0)),
    )

    out = pl.pallas_call(
        functools.partial(_bottleneck_kernel, W=W),
        out_shape=jax.ShapeDtypeStruct((N, Cout, HW), jnp.float32),
        grid_spec=grid_spec,
        compiler_params=pltpu.CompilerParams(
            dimension_semantics=("parallel",)),
    )(x, w1t, w2t, w3t, p1, p2, p3, gm, go, tap_mask)

    return out.reshape(N, Cout, H, W)                                     # NCHW


# ----------------------------- pure-JAX reference -----------------------------
def _ref_forward(x, params):
    G = params['num_groups']

    def conv1x1(x, w, b):
        out = jnp.einsum('nchw,oc->nohw', x, w, precision=lax.Precision.HIGHEST)
        return out + b.reshape(1, -1, 1, 1)

    def conv3x3(x, w, b):
        out = lax.conv_general_dilated(
            x, w, (1, 1), ((1, 1), (1, 1)),
            dimension_numbers=('NCHW', 'OIHW', 'NCHW'),
            precision=lax.Precision.HIGHEST)
        return out + b.reshape(1, -1, 1, 1)

    def gn(y, gamma, beta):
        N, C, H, W = y.shape
        yg = y.reshape(N, G, C // G, H, W)
        mean = yg.mean(axis=(2, 3, 4), keepdims=True)
        var = jnp.mean((yg - mean) ** 2, axis=(2, 3, 4), keepdims=True)
        yn = ((yg - mean) / jnp.sqrt(var + EPS)).reshape(N, C, H, W)
        return yn * gamma.reshape(1, -1, 1, 1) + beta.reshape(1, -1, 1, 1)

    p = params
    y = jax.nn.relu(gn(conv1x1(x, p['w1'], p['b1']), p['g1'], p['be1']))
    y = jax.nn.relu(gn(conv3x3(y, p['w2'], p['b2']), p['g2'], p['be2']))
    y = jax.nn.relu(gn(conv1x1(y, p['w3'], p['b3']), p['g3'], p['be3']))
    return jax.nn.relu(x + y)


if __name__ == "__main__":
    # BottleneckBlock(in_planes=32, planes=32, norm_fn='group', stride=1)
    in_planes, planes = 32, 32
    mid = planes // 4              # 8
    num_groups = planes // 8       # 4
    N, H, W = 2, 16, 16

    key = jax.random.PRNGKey(0)
    ks = jax.random.split(key, 14)
    f32 = jnp.float32
    params = {
        'num_groups': num_groups,
        # conv weights in PyTorch-style layouts: 1x1 as (Cout, Cin), 3x3 as OIHW
        'w1': 0.2 * jax.random.normal(ks[0], (mid, in_planes), f32),
        'b1': 0.1 * jax.random.normal(ks[1], (mid,), f32),
        'g1': 1.0 + 0.1 * jax.random.normal(ks[2], (mid,), f32),
        'be1': 0.1 * jax.random.normal(ks[3], (mid,), f32),
        'w2': 0.2 * jax.random.normal(ks[4], (mid, mid, 3, 3), f32),
        'b2': 0.1 * jax.random.normal(ks[5], (mid,), f32),
        'g2': 1.0 + 0.1 * jax.random.normal(ks[6], (mid,), f32),
        'be2': 0.1 * jax.random.normal(ks[7], (mid,), f32),
        'w3': 0.2 * jax.random.normal(ks[8], (planes, mid), f32),
        'b3': 0.1 * jax.random.normal(ks[9], (planes,), f32),
        'g3': 1.0 + 0.1 * jax.random.normal(ks[10], (planes,), f32),
        'be3': 0.1 * jax.random.normal(ks[11], (planes,), f32),
    }
    x = jax.random.normal(ks[12], (N, in_planes, H, W), f32)

    out = jax.block_until_ready(bottleneck_block(x, params))
    ref = jax.block_until_ready(_ref_forward(x, params))

    assert out.shape == (N, planes, H, W), out.shape
    err = float(jnp.max(jnp.abs(out - ref)))
    # bf16 MXU operands (f32 accumulation) vs a HIGHEST-precision f32 reference.
    assert jnp.allclose(out, ref, rtol=2e-2, atol=5e-2), err
    print("KERNEL_OK")
</pallas_src>

<mosaic_0001>
module attributes {stable_mosaic.version = 11 : i64} {
  func.func @_bottleneck_kernel(%arg0: i32, %arg1: memref<1x32x256xf32, #tpu.memory_space<vmem>>, %arg2: memref<8x32xbf16, #tpu.memory_space<vmem>>, %arg3: memref<8x72xbf16, #tpu.memory_space<vmem>>, %arg4: memref<32x8xbf16, #tpu.memory_space<vmem>>, %arg5: memref<3x8x1xf32, #tpu.memory_space<vmem>>, %arg6: memref<3x8x1xf32, #tpu.memory_space<vmem>>, %arg7: memref<3x32x1xf32, #tpu.memory_space<vmem>>, %arg8: memref<8x8xf32, #tpu.memory_space<vmem>>, %arg9: memref<32x32xf32, #tpu.memory_space<vmem>>, %arg10: memref<72x256xf32, #tpu.memory_space<vmem>>, %arg11: memref<1x32x256xf32, #tpu.memory_space<vmem>>) attributes {dimension_semantics = [#tpu.dimension_semantics<parallel>], iteration_bounds = array<i64: 2>, scalar_prefetch = 0 : i64, scratch_operands = 0 : i64, tpu.core_type = #tpu.core_type<tc>, window_params = [{transform_indices = @transform_0, window_bounds = array<i64: 1, 32, 256>}, {pipeline_mode = #tpu.pipeline_mode<synchronous>, transform_indices = @transform_1, window_bounds = array<i64: 8, 32>}, {pipeline_mode = #tpu.pipeline_mode<synchronous>, transform_indices = @transform_2, window_bounds = array<i64: 8, 72>}, {pipeline_mode = #tpu.pipeline_mode<synchronous>, transform_indices = @transform_3, window_bounds = array<i64: 32, 8>}, {pipeline_mode = #tpu.pipeline_mode<synchronous>, transform_indices = @transform_4, window_bounds = array<i64: 3, 8, 1>}, {pipeline_mode = #tpu.pipeline_mode<synchronous>, transform_indices = @transform_5, window_bounds = array<i64: 3, 8, 1>}, {pipeline_mode = #tpu.pipeline_mode<synchronous>, transform_indices = @transform_6, window_bounds = array<i64: 3, 32, 1>}, {pipeline_mode = #tpu.pipeline_mode<synchronous>, transform_indices = @transform_7, window_bounds = array<i64: 8, 8>}, {pipeline_mode = #tpu.pipeline_mode<synchronous>, transform_indices = @transform_8, window_bounds = array<i64: 32, 32>}, {pipeline_mode = #tpu.pipeline_mode<synchronous>, transform_indices = @transform_9, window_bounds = array<i64: 72, 256>}, {transform_indices = @transform_10, window_bounds = array<i64: 1, 32, 256>}]} {
    %c0 = arith.constant 0 : index
    %c0_0 = arith.constant 0 : index
    %c0_1 = arith.constant 0 : index
    %0 = vector.load %arg1[%c0, %c0_0, %c0_1] : memref<1x32x256xf32, #tpu.memory_space<vmem>>, vector<1x32x256xf32>
    %1 = vector.shape_cast %0 : vector<1x32x256xf32> to vector<32x256xf32>
    %c0_2 = arith.constant 0 : index
    %c0_3 = arith.constant 0 : index
    %2 = vector.load %arg2[%c0_2, %c0_3] : memref<8x32xbf16, #tpu.memory_space<vmem>>, vector<8x32xbf16>
    %3 = arith.truncf %1 : vector<32x256xf32> to vector<32x256xbf16>
    %cst = arith.constant dense<0.000000e+00> : vector<8x256xf32>
    %4 = tpu.matmul %2, %3, %cst {dimension_numbers = #tpu.dot_dimension_numbers<[1], [0], [0], [1], [0, 0, 1, 1], [], []>} : vector<8x32xbf16>, vector<32x256xbf16>, vector<8x256xf32> -> vector<8x256xf32>
    %c0_4 = arith.constant 0 : index
    %c0_5 = arith.constant 0 : index
    %c0_6 = arith.constant 0 : index
    %5 = vector.load %arg5[%c0_4, %c0_5, %c0_6] : memref<3x8x1xf32, #tpu.memory_space<vmem>>, vector<1x8x1xf32>
    %6 = vector.shape_cast %5 : vector<1x8x1xf32> to vector<8x1xf32>
    %c1 = arith.constant 1 : index
    %c0_7 = arith.constant 0 : index
    %c0_8 = arith.constant 0 : index
    %7 = vector.load %arg5[%c1, %c0_7, %c0_8] : memref<3x8x1xf32, #tpu.memory_space<vmem>>, vector<1x8x1xf32>
    %8 = vector.shape_cast %7 : vector<1x8x1xf32> to vector<8x1xf32>
    %c2 = arith.constant 2 : index
    %c0_9 = arith.constant 0 : index
    %c0_10 = arith.constant 0 : index
    %9 = vector.load %arg5[%c2, %c0_9, %c0_10] : memref<3x8x1xf32, #tpu.memory_space<vmem>>, vector<1x8x1xf32>
    %10 = vector.shape_cast %9 : vector<1x8x1xf32> to vector<8x1xf32>
    %11 = vector.broadcast %6 : vector<8x1xf32> to vector<8x256xf32>
    %12 = arith.addf %4, %11 : vector<8x256xf32>
    %cst_11 = arith.constant dense<0.000000e+00> : vector<8xf32>
    %13 = vector.multi_reduction <add>, %12, %cst_11 [1] : vector<8x256xf32> to vector<8xf32>
    %14 = vector.shape_cast %13 : vector<8xf32> to vector<8x1xf32>
    %15 = arith.mulf %12, %12 : vector<8x256xf32>
    %cst_12 = arith.constant dense<0.000000e+00> : vector<8xf32>
    %16 = vector.multi_reduction <add>, %15, %cst_12 [1] : vector<8x256xf32> to vector<8xf32>
    %17 = vector.shape_cast %16 : vector<8xf32> to vector<8x1xf32>
    %c0_13 = arith.constant 0 : index
    %c0_14 = arith.constant 0 : index
    %18 = vector.load %arg8[%c0_13, %c0_14] : memref<8x8xf32, #tpu.memory_space<vmem>>, vector<8x8xf32>
    %cst_15 = arith.constant dense<0.000000e+00> : vector<8x1xf32>
    %19 = tpu.matmul %18, %14, %cst_15 {dimension_numbers = #tpu.dot_dimension_numbers<[1], [0], [0], [1], [0, 0, 1, 1], [], []>} : vector<8x8xf32>, vector<8x1xf32>, vector<8x1xf32> -> vector<8x1xf32>
    %c0_16 = arith.constant 0 : index
    %c0_17 = arith.constant 0 : index
    %20 = vector.load %arg8[%c0_16, %c0_17] : memref<8x8xf32, #tpu.memory_space<vmem>>, vector<8x8xf32>
    %cst_18 = arith.constant dense<0.000000e+00> : vector<8x1xf32>
    %21 = tpu.matmul %20, %17, %cst_18 {dimension_numbers = #tpu.dot_dimension_numbers<[1], [0], [0], [1], [0, 0, 1, 1], [], []>} : vector<8x8xf32>, vector<8x1xf32>, vector<8x1xf32> -> vector<8x1xf32>
    %22 = arith.mulf %19, %19 : vector<8x1xf32>
    %23 = arith.subf %21, %22 : vector<8x1xf32>
    %cst_19 = arith.constant 9.99999974E-6 : f32
    %24 = vector.broadcast %cst_19 : f32 to vector<8x1xf32>
    %25 = arith.addf %23, %24 : vector<8x1xf32>
    %26 = math.rsqrt %25 : vector<8x1xf32>
    %27 = vector.broadcast %19 : vector<8x1xf32> to vector<8x256xf32>
    %28 = arith.subf %12, %27 : vector<8x256xf32>
    %29 = arith.mulf %26, %8 : vector<8x1xf32>
    %30 = vector.broadcast %29 : vector<8x1xf32> to vector<8x256xf32>
    %31 = arith.mulf %28, %30 : vector<8x256xf32>
    %32 = vector.broadcast %10 : vector<8x1xf32> to vector<8x256xf32>
    %33 = arith.addf %31, %32 : vector<8x256xf32>
    %cst_20 = arith.constant 0.000000e+00 : f32
    %34 = vector.broadcast %cst_20 : f32 to vector<8x256xf32>
    %35 = arith.maximumf %33, %34 : vector<8x256xf32>
    %c17_i32 = arith.constant 17 : i32
    %36 = tpu.dynamic_rotate %35 by %c17_i32 dim 1 : vector<8x256xf32>, i32 -> vector<8x256xf32>
    %c16_i32 = arith.constant 16 : i32
    %37 = tpu.dynamic_rotate %35 by %c16_i32 dim 1 : vector<8x256xf32>, i32 -> vector<8x256xf32>
    %c15_i32 = arith.constant 15 : i32
    %38 = tpu.dynamic_rotate %35 by %c15_i32 dim 1 : vector<8x256xf32>, i32 -> vector<8x256xf32>
    %c1_i32 = arith.constant 1 : i32
    %39 = tpu.dynamic_rotate %35 by %c1_i32 dim 1 : vector<8x256xf32>, i32 -> vector<8x256xf32>
    %c255_i32 = arith.constant 255 : i32
    %40 = tpu.dynamic_rotate %35 by %c255_i32 dim 1 : vector<8x256xf32>, i32 -> vector<8x256xf32>
    %c241_i32 = arith.constant 241 : i32
    %41 = tpu.dynamic_rotate %35 by %c241_i32 dim 1 : vector<8x256xf32>, i32 -> vector<8x256xf32>
    %c240_i32 = arith.constant 240 : i32
    %42 = tpu.dynamic_rotate %35 by %c240_i32 dim 1 : vector<8x256xf32>, i32 -> vector<8x256xf32>
    %c239_i32 = arith.constant 239 : i32
    %43 = tpu.dynamic_rotate %35 by %c239_i32 dim 1 : vector<8x256xf32>, i32 -> vector<8x256xf32>
    %44 = tpu.concatenate %36, %37, %38, %39, %35, %40, %41, %42, %43 in 0 : vector<8x256xf32>, vector<8x256xf32>, vector<8x256xf32>, vector<8x256xf32>, vector<8x256xf32>, vector<8x256xf32>, vector<8x256xf32>, vector<8x256xf32>, vector<8x256xf32> -> vector<72x256xf32>
    %c0_21 = arith.constant 0 : index
    %c0_22 = arith.constant 0 : index
    %45 = vector.load %arg10[%c0_21, %c0_22] : memref<72x256xf32, #tpu.memory_space<vmem>>, vector<72x256xf32>
    %46 = arith.mulf %44, %45 : vector<72x256xf32>
    %c0_23 = arith.constant 0 : index
    %c0_24 = arith.constant 0 : index
    %47 = vector.load %arg3[%c0_23, %c0_24] : memref<8x72xbf16, #tpu.memory_space<vmem>>, vector<8x72xbf16>
    %48 = arith.truncf %46 : vector<72x256xf32> to vector<72x256xbf16>
    %cst_25 = arith.constant dense<0.000000e+00> : vector<8x256xf32>
    %49 = tpu.matmul %47, %48, %cst_25 {dimension_numbers = #tpu.dot_dimension_numbers<[1], [0], [0], [1], [0, 0, 1, 1], [], []>} : vector<8x72xbf16>, vector<72x256xbf16>, vector<8x256xf32> -> vector<8x256xf32>
    %c0_26 = arith.constant 0 : index
    %c0_27 = arith.constant 0 : index
    %c0_28 = arith.constant 0 : index
    %50 = vector.load %arg6[%c0_26, %c0_27, %c0_28] : memref<3x8x1xf32, #tpu.memory_space<vmem>>, vector<1x8x1xf32>
    %51 = vector.shape_cast %50 : vector<1x8x1xf32> to vector<8x1xf32>
    %c1_29 = arith.constant 1 : index
    %c0_30 = arith.constant 0 : index
    %c0_31 = arith.constant 0 : index
    %52 = vector.load %arg6[%c1_29, %c0_30, %c0_31] : memref<3x8x1xf32, #tpu.memory_space<vmem>>, vector<1x8x1xf32>
    %53 = vector.shape_cast %52 : vector<1x8x1xf32> to vector<8x1xf32>
    %c2_32 = arith.constant 2 : index
    %c0_33 = arith.constant 0 : index
    %c0_34 = arith.constant 0 : index
    %54 = vector.load %arg6[%c2_32, %c0_33, %c0_34] : memref<3x8x1xf32, #tpu.memory_space<vmem>>, vector<1x8x1xf32>
    %55 = vector.shape_cast %54 : vector<1x8x1xf32> to vector<8x1xf32>
    %56 = vector.broadcast %51 : vector<8x1xf32> to vector<8x256xf32>
    %57 = arith.addf %49, %56 : vector<8x256xf32>
    %cst_35 = arith.constant dense<0.000000e+00> : vector<8xf32>
    %58 = vector.multi_reduction <add>, %57, %cst_35 [1] : vector<8x256xf32> to vector<8xf32>
    %59 = vector.shape_cast %58 : vector<8xf32> to vector<8x1xf32>
    %60 = arith.mulf %57, %57 : vector<8x256xf32>
    %cst_36 = arith.constant dense<0.000000e+00> : vector<8xf32>
    %61 = vector.multi_reduction <add>, %60, %cst_36 [1] : vector<8x256xf32> to vector<8xf32>
    %62 = vector.shape_cast %61 : vector<8xf32> to vector<8x1xf32>
    %c0_37 = arith.constant 0 : index
    %c0_38 = arith.constant 0 : index
    %63 = vector.load %arg8[%c0_37, %c0_38] : memref<8x8xf32, #tpu.memory_space<vmem>>, vector<8x8xf32>
    %cst_39 = arith.constant dense<0.000000e+00> : vector<8x1xf32>
    %64 = tpu.matmul %63, %59, %cst_39 {dimension_numbers = #tpu.dot_dimension_numbers<[1], [0], [0], [1], [0, 0, 1, 1], [], []>} : vector<8x8xf32>, vector<8x1xf32>, vector<8x1xf32> -> vector<8x1xf32>
    %c0_40 = arith.constant 0 : index
    %c0_41 = arith.constant 0 : index
    %65 = vector.load %arg8[%c0_40, %c0_41] : memref<8x8xf32, #tpu.memory_space<vmem>>, vector<8x8xf32>
    %cst_42 = arith.constant dense<0.000000e+00> : vector<8x1xf32>
    %66 = tpu.matmul %65, %62, %cst_42 {dimension_numbers = #tpu.dot_dimension_numbers<[1], [0], [0], [1], [0, 0, 1, 1], [], []>} : vector<8x8xf32>, vector<8x1xf32>, vector<8x1xf32> -> vector<8x1xf32>
    %67 = arith.mulf %64, %64 : vector<8x1xf32>
    %68 = arith.subf %66, %67 : vector<8x1xf32>
    %cst_43 = arith.constant 9.99999974E-6 : f32
    %69 = vector.broadcast %cst_43 : f32 to vector<8x1xf32>
    %70 = arith.addf %68, %69 : vector<8x1xf32>
    %71 = math.rsqrt %70 : vector<8x1xf32>
    %72 = vector.broadcast %64 : vector<8x1xf32> to vector<8x256xf32>
    %73 = arith.subf %57, %72 : vector<8x256xf32>
    %74 = arith.mulf %71, %53 : vector<8x1xf32>
    %75 = vector.broadcast %74 : vector<8x1xf32> to vector<8x256xf32>
    %76 = arith.mulf %73, %75 : vector<8x256xf32>
    %77 = vector.broadcast %55 : vector<8x1xf32> to vector<8x256xf32>
    %78 = arith.addf %76, %77 : vector<8x256xf32>
    %cst_44 = arith.constant 0.000000e+00 : f32
    %79 = vector.broadcast %cst_44 : f32 to vector<8x256xf32>
    %80 = arith.maximumf %78, %79 : vector<8x256xf32>
    %c0_45 = arith.constant 0 : index
    %c0_46 = arith.constant 0 : index
    %81 = vector.load %arg4[%c0_45, %c0_46] : memref<32x8xbf16, #tpu.memory_space<vmem>>, vector<32x8xbf16>
    %82 = arith.truncf %80 : vector<8x256xf32> to vector<8x256xbf16>
    %cst_47 = arith.constant dense<0.000000e+00> : vector<32x256xf32>
    %83 = tpu.matmul %81, %82, %cst_47 {dimension_numbers = #tpu.dot_dimension_numbers<[1], [0], [0], [1], [0, 0, 1, 1], [], []>} : vector<32x8xbf16>, vector<8x256xbf16>, vector<32x256xf32> -> vector<32x256xf32>
    %c0_48 = arith.constant 0 : index
    %c0_49 = arith.constant 0 : index
    %c0_50 = arith.constant 0 : index
    %84 = vector.load %arg7[%c0_48, %c0_49, %c0_50] : memref<3x32x1xf32, #tpu.memory_space<vmem>>, vector<1x32x1xf32>
    %85 = vector.shape_cast %84 : vector<1x32x1xf32> to vector<32x1xf32>
    %c1_51 = arith.constant 1 : index
    %c0_52 = arith.constant 0 : index
    %c0_53 = arith.constant 0 : index
    %86 = vector.load %arg7[%c1_51, %c0_52, %c0_53] : memref<3x32x1xf32, #tpu.memory_space<vmem>>, vector<1x32x1xf32>
    %87 = vector.shape_cast %86 : vector<1x32x1xf32> to vector<32x1xf32>
    %c2_54 = arith.constant 2 : index
    %c0_55 = arith.constant 0 : index
    %c0_56 = arith.constant 0 : index
    %88 = vector.load %arg7[%c2_54, %c0_55, %c0_56] : memref<3x32x1xf32, #tpu.memory_space<vmem>>, vector<1x32x1xf32>
    %89 = vector.shape_cast %88 : vector<1x32x1xf32> to vector<32x1xf32>
    %90 = vector.broadcast %85 : vector<32x1xf32> to vector<32x256xf32>
    %91 = arith.addf %83, %90 : vector<32x256xf32>
    %cst_57 = arith.constant dense<0.000000e+00> : vector<32xf32>
    %92 = vector.multi_reduction <add>, %91, %cst_57 [1] : vector<32x256xf32> to vector<32xf32>
    %93 = vector.shape_cast %92 : vector<32xf32> to vector<32x1xf32>
    %94 = arith.mulf %91, %91 : vector<32x256xf32>
    %cst_58 = arith.constant dense<0.000000e+00> : vector<32xf32>
    %95 = vector.multi_reduction <add>, %94, %cst_58 [1] : vector<32x256xf32> to vector<32xf32>
    %96 = vector.shape_cast %95 : vector<32xf32> to vector<32x1xf32>
    %c0_59 = arith.constant 0 : index
    %c0_60 = arith.constant 0 : index
    %97 = vector.load %arg9[%c0_59, %c0_60] : memref<32x32xf32, #tpu.memory_space<vmem>>, vector<32x32xf32>
    %cst_61 = arith.constant dense<0.000000e+00> : vector<32x1xf32>
    %98 = tpu.matmul %97, %93, %cst_61 {dimension_numbers = #tpu.dot_dimension_numbers<[1], [0], [0], [1], [0, 0, 1, 1], [], []>} : vector<32x32xf32>, vector<32x1xf32>, vector<32x1xf32> -> vector<32x1xf32>
    %c0_62 = arith.constant 0 : index
    %c0_63 = arith.constant 0 : index
    %99 = vector.load %arg9[%c0_62, %c0_63] : memref<32x32xf32, #tpu.memory_space<vmem>>, vector<32x32xf32>
    %cst_64 = arith.constant dense<0.000000e+00> : vector<32x1xf32>
    %100 = tpu.matmul %99, %96, %cst_64 {dimension_numbers = #tpu.dot_dimension_numbers<[1], [0], [0], [1], [0, 0, 1, 1], [], []>} : vector<32x32xf32>, vector<32x1xf32>, vector<32x1xf32> -> vector<32x1xf32>
    %101 = arith.mulf %98, %98 : vector<32x1xf32>
    %102 = arith.subf %100, %101 : vector<32x1xf32>
    %cst_65 = arith.constant 9.99999974E-6 : f32
    %103 = vector.broadcast %cst_65 : f32 to vector<32x1xf32>
    %104 = arith.addf %102, %103 : vector<32x1xf32>
    %105 = math.rsqrt %104 : vector<32x1xf32>
    %106 = vector.broadcast %98 : vector<32x1xf32> to vector<32x256xf32>
    %107 = arith.subf %91, %106 : vector<32x256xf32>
    %108 = arith.mulf %105, %87 : vector<32x1xf32>
    %109 = vector.broadcast %108 : vector<32x1xf32> to vector<32x256xf32>
    %110 = arith.mulf %107, %109 : vector<32x256xf32>
    %111 = vector.broadcast %89 : vector<32x1xf32> to vector<32x256xf32>
    %112 = arith.addf %110, %111 : vector<32x256xf32>
    %cst_66 = arith.constant 0.000000e+00 : f32
    %113 = vector.broadcast %cst_66 : f32 to vector<32x256xf32>
    %114 = arith.maximumf %112, %113 : vector<32x256xf32>
    %115 = arith.addf %1, %114 : vector<32x256xf32>
    %cst_67 = arith.constant 0.000000e+00 : f32
    %116 = vector.broadcast %cst_67 : f32 to vector<32x256xf32>
    %117 = arith.maximumf %115, %116 : vector<32x256xf32>
    %c0_68 = arith.constant 0 : index
    %c0_69 = arith.constant 0 : index
    %c0_70 = arith.constant 0 : index
    %118 = vector.load %arg11[%c0_68, %c0_69, %c0_70] : memref<1x32x256xf32, #tpu.memory_space<vmem>>, vector<1x32x256xf32>
    %119 = vector.shape_cast %118 : vector<1x32x256xf32> to vector<32x256xf32>
    %120 = vector.shape_cast %117 : vector<32x256xf32> to vector<1x32x256xf32>
    tpu.vector_store %arg11[%c0_68, %c0_69, %c0_70], %120 {strides = array<i32>} : memref<1x32x256xf32, #tpu.memory_space<vmem>>, vector<1x32x256xf32>,
    return
  }
  func.func @transform_0(%arg0: i32) -> (i32, i32, i32) {
    %c0_i32 = arith.constant 0 : i32
    %c0_i32_0 = arith.constant 0 : i32
    %c0_i32_1 = arith.constant 0 : i32
    return %arg0, %c0_i32, %c0_i32_0 : i32, i32, i32
  }
  func.func @transform_1(%arg0: i32) -> (i32, i32) {
    %c0_i32 = arith.constant 0 : i32
    %c0_i32_0 = arith.constant 0 : i32
    %c0_i32_1 = arith.constant 0 : i32
    return %c0_i32, %c0_i32_0 : i32, i32
  }
  func.func @transform_2(%arg0: i32) -> (i32, i32) {
    %c0_i32 = arith.constant 0 : i32
    %c0_i32_0 = arith.constant 0 : i32
    %c0_i32_1 = arith.constant 0 : i32
    return %c0_i32, %c0_i32_0 : i32, i32
  }
  func.func @transform_3(%arg0: i32) -> (i32, i32) {
    %c0_i32 = arith.constant 0 : i32
    %c0_i32_0 = arith.constant 0 : i32
    %c0_i32_1 = arith.constant 0 : i32
    return %c0_i32, %c0_i32_0 : i32, i32
  }
  func.func @transform_4(%arg0: i32) -> (i32, i32, i32) {
    %c0_i32 = arith.constant 0 : i32
    %c0_i32_0 = arith.constant 0 : i32
    %c0_i32_1 = arith.constant 0 : i32
    %c0_i32_2 = arith.constant 0 : i32
    return %c0_i32, %c0_i32_0, %c0_i32_1 : i32, i32, i32
  }
  func.func @transform_5(%arg0: i32) -> (i32, i32, i32) {
    %c0_i32 = arith.constant 0 : i32
    %c0_i32_0 = arith.constant 0 : i32
    %c0_i32_1 = arith.constant 0 : i32
    %c0_i32_2 = arith.constant 0 : i32
    return %c0_i32, %c0_i32_0, %c0_i32_1 : i32, i32, i32
  }
  func.func @transform_6(%arg0: i32) -> (i32, i32, i32) {
    %c0_i32 = arith.constant 0 : i32
    %c0_i32_0 = arith.constant 0 : i32
    %c0_i32_1 = arith.constant 0 : i32
    %c0_i32_2 = arith.constant 0 : i32
    return %c0_i32, %c0_i32_0, %c0_i32_1 : i32, i32, i32
  }
  func.func @transform_7(%arg0: i32) -> (i32, i32) {
    %c0_i32 = arith.constant 0 : i32
    %c0_i32_0 = arith.constant 0 : i32
    %c0_i32_1 = arith.constant 0 : i32
    return %c0_i32, %c0_i32_0 : i32, i32
  }
  func.func @transform_8(%arg0: i32) -> (i32, i32) {
    %c0_i32 = arith.constant 0 : i32
    %c0_i32_0 = arith.constant 0 : i32
    %c0_i32_1 = arith.constant 0 : i32
    return %c0_i32, %c0_i32_0 : i32, i32
  }
  func.func @transform_9(%arg0: i32) -> (i32, i32) {
    %c0_i32 = arith.constant 0 : i32
    %c0_i32_0 = arith.constant 0 : i32
    %c0_i32_1 = arith.constant 0 : i32
    return %c0_i32, %c0_i32_0 : i32, i32
  }
  func.func @transform_10(%arg0: i32) -> (i32, i32, i32) {
    %c0_i32 = arith.constant 0 : i32
    %c0_i32_0 = arith.constant 0 : i32
    %c0_i32_1 = arith.constant 0 : i32
    return %arg0, %c0_i32, %c0_i32_0 : i32, i32, i32
  }
}

</mosaic_0001>

<bundles_post_ra>
// kernel: tpu_custom_call.1
= control target key start
LH: loop header
LB: loop body
LE: loop exit
PB: predicated region body
PF: predicated region fallthrough
CT: control target
= control target key end

     0   :  { %15 = vsyncpa [#allocation3], 0  ;;  %s2371_s0 = inlined_call_operand.hbm [shape: f32[2,32,256], index: 0, kind: input, shape index: {}]   ;;  %s2372_s1 = inlined_call_operand.vmem [shape: bf16[8,32], index: 1, kind: input, shape index: {}]   ;;  %s2373_s2 = inlined_call_operand.vmem [shape: bf16[8,72], index: 2, kind: input, shape index: {}]   ;;  %s2374_s3 = inlined_call_operand.vmem [shape: bf16[32,8], index: 3, kind: input, shape index: {}]   ;;  %s2375_s4 = inlined_call_operand.vmem [shape: f32[3,8,1], index: 4, kind: input, shape index: {}]   ;;  %s2376_s5 = inlined_call_operand.vmem [shape: f32[3,8,1], index: 5, kind: input, shape index: {}]   ;;  %s2377_s6 = inlined_call_operand.vmem [shape: f32[3,32,1], index: 6, kind: input, shape index: {}]   ;;  %s2378_s7 = inlined_call_operand.vmem [shape: f32[8,8], index: 7, kind: input, shape index: {}]   ;;  %s2379_s8 = inlined_call_operand.vmem [shape: f32[32,32], index: 8, kind: input, shape index: {}]   ;;  %s2380_s9 = inlined_call_operand.vmem [shape: f32[72,256], index: 9, kind: input, shape index: {}]   ;;  %s2381_s10 = inlined_call_operand.hbm [shape: f32[2,32,256], index: 10, kind: output, shape index: {}]  }
   0x1   :  { %17 = vsyncpa [#allocation3 + $0x1], 0 }
   0x2   :  { %18 = vsyncpa [#allocation4], 0 }
   0x3   :  { %20 = vsyncpa [#allocation4 + $0x1], 0  ;;  %s1912_s13 = smov 0   ;;  %s1914_s14 = smov 0  }
   0x4   :  { %s1916_s15 = smov 0   ;;  %s1918_s16 = smov 0  }
   0x5 LB: > { %s1933_s17 = sadd.s32 4294967295, %s1839_s16   ;;  %s1527_s18 = sadd.s32 4294967294, %s1839_s16   ;;  %s1839_s16 = sphi %s1918_s16, %s2396_s16   ;;  %s1835_s15 = sphi %s1916_s15, %s2395_s15   ;;  %s1831_s14 = sphi %s1914_s14, %s2394_s14   ;;  %s1827_s13 = sphi %s1912_s13, %s2393_s13  }
   0x6   : > { %s1937_s19 = sadd.s32 1, %s1839_s16   ;;  %s33_s20 = sadd.s32 1, %s1835_s15 }
   0x7   : > { %s30_s21 = ssub.s32 %s1839_s16, %s1937_s19  ;;  %p40_p0 = scmp.ne.s32.totalorder %s1835_s15, %s1831_s14 }
   0x8   : > { %p31_p1 = scmp.eq.s32.totalorder %s30_s21, 0  ;;  %p41_p2 = scmp.eq.s32.totalorder %s1839_s16, 0 }
   0x9   : > { %p46_p3 = scmp.ne.s32.totalorder %s1831_s14, %s1827_s13  ;;  %p47_p4 = scmp.eq.s32.totalorder %s1933_s17, 0 }
   0xa   : > { %s1949_s22 = scalar_select %p31_p1, %s1835_s15, %s33_s20  }
   0xb   : > { %p1951_p5 = por %p41_p2, %p40_p0  ;;  %p1955_p6 = por %p47_p4, %p46_p3 }
   0xc   : > { %2383 = sst [smem:[#allocation8_spill]] %s1949_s22  ;;  %p259_p7 = scmp.eq.s32.totalorder %s1933_s17, 1 }
   0xd   : > { %p265_p8 = scmp.eq.s32.totalorder %s1527_s18, 1  ;;  %p1679_p10 = scmp.lt.s32.totalorder %s1839_s16, 2 }
   0xe   : > { %p1962_p11 = por %p259_p7, %p40_p0  ;;  %s312_s27 = sand.u32 1, %s1835_s15  }
   0xf   : > { %p1966_p12 = por %p265_p8, %p46_p3  ;;  %s1573_s28 = sshll.u32 %s1839_s16, 10 }
  0x10   : > { %s2386_s25 = scalar_select %p1962_p11, 1, 0 }
  0x11   : > { %s2387_s26 = scalar_select %p1966_p12, 1, 0 }
  0x12   : > { %s1530_s29 = sshll.u32 %s312_s27, 6  ;;  %s1975_s12 = scalar_lea.hbm %s2371_s0, %s1573_s28 }
  0x13   : > { %s316_s18 = scalar_lea.vmem [#allocation2], %s1530_s29  ;;  %p1979_p13 = pnand %p1679_p10, %p1951_p5 }
  0x14   : > { %s323_s20 = sshll.u32 %s316_s18, 4  ;;  %s1985_s22 = scalar_lea.sflag [#allocation3], %s312_s27  ;;  %s1983_s20 = int_to_ptr.vmem [resolvable:$true] %s323_s20 }
  0x15   : > { %s1743_s30 = scalar_lea.hbm %s1975_s12, 1024  ;;  %p1745_p1 = pneg %p1979_p13 }
  0x16   : > { %p1744_p0 = scmp.ne.s32.totalorder %s1975_s12, %s1743_s30  ;;  %s1748_s29 = scalar_lea.hbm %s2371_s0, 2048 }
  0x17   : > { %p1749_p4 = scmp.lt.u32.totalorder %s1975_s12, %s2371_s0  ;;  %p1750_p5 = scmp.lt.u32.totalorder %s1748_s29, %s1743_s30 }
  0x18   : > { %p1746_p2 = pnand %p1745_p1, %p1744_p0  ;;  %p1752_p8 = scmp.lt.u32.totalorder %s1743_s30, %s1975_s12 }
  0x19   : > { %p1751_p7 = por %p1750_p5, %p1749_p4 }
  0x1a   : > { %p1747_p3 = pneg %p1746_p2 }
  0x1b   : > { %p1753_p10 = por %p1752_p8, %p1751_p7 }
  0x1d   : > { %p1754_p9 = pnand %p1753_p10, %p1747_p3 }
  0x1f   : > { %1757 = shalt.err (!%p1754_p9)
}
  0x20   : > { %s1758_s27 = scalar_lea.vmem %s1983_s20, 1024  ;;  %s1841_s28 = smov [#allocation2]  }
  0x21   : > { %p1759_p0 = scmp.ne.s32.totalorder %s1983_s20, %s1758_s27  ;;  %s1763_s23 = sshll.u32 %s1841_s28, 4  ;;  %s1764_s23 = int_to_ptr.vmem [resolvable:$false] %s1763_s23 }
  0x22   : > { %s1765_s11 = scalar_lea.vmem %s1764_s23, 2048  ;;  %p1766_p11 = scmp.lt.s32.totalorder %s1983_s20, %s1764_s23 }
  0x23   : > { %p1761_p2 = pnand %p1759_p0, %p1745_p1  ;;  %p1767_p4 = scmp.lt.s32.totalorder %s1765_s11, %s1758_s27 }
  0x25   : > { %p1762_p12 = pneg %p1761_p2  ;;  %p1768_p5 = por %p1767_p4, %p1766_p11 }
  0x27   : > { %p1769_p7 = pnand %p1768_p5, %p1762_p12 }
  0x29   : > { %1772 = shalt.err (!%p1769_p7)
}
  0x2a   : > { %s1842_s30 = smov 256   ;;  %s1843_s29 = smov 16  }
  0x2b   : > { %1674 = dma.hbm_to_vmem [thread:$0]  (!%p1979_p13), %s1975_s12, 1024, %s1983_s20, %s1985_s22, %s1842_s30, %s1842_s30, %s1843_s29  }
  0x2c   : > { %p1533_p9 = scmp.ge.s32.totalorder %s1839_s16, 1  ;;  %p331_p1 = scmp.lt.s32.totalorder %s1839_s16, 3 }
  0x2e   : > { %p332_p3 = pnand %p1533_p9, %p331_p1 }
  0x2f   : > { %s2016_s18 = sand.u32 (!%p332_p3), 1, %s1831_s14  }
  0x30   : > { %335 = sbr.rel (%p332_p3) target bundleno = 2469 (0x9a5), region = 60  ;;  %s1534_s27 = sshll.u32 (!%p332_p3), %s2016_s18, 6 }
  0x31   : > { %s338_s28 = scalar_lea.sflag (!%p332_p3), [#allocation3], %s2016_s18  ;;  %s341_s23 = scalar_lea.vmem (!%p332_p3), [#allocation2], %s1534_s27 }
  0x37   : > { %1818 = dma.done.wait (%p1955_p6), %s338_s28, 1024  }
  0x38   : > { %1820 = vsyncadd (%p1955_p6), %s338_s28, 4294966272  ;;  %v1844_v0 = vmov 0   ;;  %v2029_v1 = vld [vmem:[%s341_s23 + $0x8] sm:$0xff]  ;;  %v2031_v2 = vld [vmem:[%s341_s23 + $0x18] sm:$0xff]  ;;  %vm402_vm0 = vcmask 261120   ;;  %v1845_v15 = vmov 0.0   ;;  %v632_v53 = vlaneseq }
  0x39   : > { %438 = vmatprep.mubr.bf16.mxu0 %v1844_v0  ;;  %1727 = vset.pattern.permute.xlu0 %v1844_v0  ;;  %v2033_v3 = vld [vmem:[%s341_s23] sm:$0xff]  ;;  %v389_v4 = vpack.c.bf16 %v2031_v2, %v2029_v1  ;;  %v2037_v5 = vld [vmem:[%s341_s23 + $0x10] sm:$0xff]  ;;  %v2039_v6 = vld [vmem:[%s341_s23 + $0x28] sm:$0xff]  ;;  %vm1846_vm1 = vmmov 0   ;;  %vm456_vm2 = vcmask 64512   ;;  %s1847_s22 = smov 16  }
  0x3a   : > { %1728 = vset.pattern.permute.xlu1 %v1844_v0  ;;  %v2041_v7 = vld [vmem:[%s341_s23 + $0x38] sm:$0xff]  ;;  %v388_v8 = vpack.c.bf16 %v2037_v5, %v2033_v3  ;;  %v2047_v10 = vld [vmem:[%s341_s23 + $0x20] sm:$0xff]  ;;  %v2049_v11 = vld [vmem:[%s341_s23 + $0x30] sm:$0xff]  ;;  %1599 = vmatprep.subr.mxu1 %v1845_v15  ;;  %s1848_s24 = smov 17   ;;  %s1849_s12 = smov 127   ;;  %v2110_v55 = vand.u32 127, %v632_v53 }
  0x3b   : > { %v391_v9 = vpack.c.bf16 %v2041_v7, %v2039_v6  ;;  %406 = vmatprep.subr.bf16.mxu0 %v389_v4  ;;  %v392_v12 = vld [vmem:[%s2375_s4] sm:$0xff]  ;;  %v390_v13 = vpack.c.bf16 %v2049_v11, %v2047_v10  ;;  %1601 = vmatprep.mubr.msk.f32.mxu1 %vm1846_vm1, %v1845_v15  ;;  %v1536_v37 = vld [vmem:[%s2375_s4 + $0x8] sm:$0xff]  ;;  %v1537_v40 = vld [vmem:[%s2375_s4 + $0x10] sm:$0xff]  ;;  %s1850_s20 = smov 113   ;;  %s1851_s21 = smov 112   ;;  %vm747_vm11 = vcmask 1043456  }
  0x3c   : > { %407 = vmatpush1.bf16.msra.mxu0 %v388_v8  ;;  %399 = vperm.xlu0 %1727, %v392_v12   ;;  %v387_v14 = vld [vmem:[%s2372_s1] sm:$0xf]  ;;  %s1852_s11 = smov 15   ;;  %s1853_s30 = smov 111   ;;  %vm634_vm3 = vcmp.lt.s32.totalorder %v2110_v55, 17  ;;  %vm641_vm4 = vcmp.lt.s32.totalorder %v2110_v55, 16 }
  0x3d   : > { %408 = vmatprep.subr.bf16.mxu0 %v391_v9  ;;  %v2069_v27 = vld [vmem:[%s2378_s7] sm:$0xff]  ;;  %s1854_s23 = smov 1   ;;  %v687_v58 = vld [vmem:[%s2380_s9 + $0x8] sm:$0xff]  ;;  %v688_v61 = vld [vmem:[%s2380_s9 + $0x10] sm:$0xff]  ;;  %vm648_vm5 = vcmp.lt.s32.totalorder %v2110_v55, 15  ;;  %vm655_vm6 = vcmp.lt.s32.totalorder %v2110_v55, 1 }
  0x3e   : > { %v733_v52 = vld [vmem:[%s2376_s5] sm:$0xff]  ;;  %v689_v62 = vld [vmem:[%s2380_s9 + $0x18] sm:$0xff]  ;;  %vm662_vm7 = vcmp.lt.s32.totalorder %v2110_v55, 127  ;;  %vm669_vm8 = vcmp.lt.s32.totalorder %v2110_v55, 113  ;;  %vm676_vm9 = vcmp.lt.s32.totalorder %v2110_v55, 112  ;;  %vm683_vm10 = vcmp.lt.s32.totalorder %v2110_v55, 111 }
  0x3f   : > { %v686_v57 = vld [vmem:[%s2380_s9] sm:$0xff]  ;;  %vm743_vm12 = vcmask 588800   ;;  %s1574_s28 = sshll.u32 %s1933_s17, 10  ;;  %s1441_s17 = scalar_lea.sflag [#allocation4], %s2016_s18 }
  0x40   : > { %409 = vmatpush1.bf16.msra.mxu0 %v390_v13  ;;  %p2389_p11 = scmp.ne.s32.totalorder %s2386_s25, 0  ;;  %s1855_s29 = smov [#allocation5]  }
  0x41   : > { %1609 = vmatprep.subr.mxu0 %v1845_v15 }
  0x43   : > { %1538 = vmatmul.mubr.msk.bf16.vlgmr.msra.gmra.mrb[0].mxu0 %vm402_vm0, %v387_v14 }
  0x44   : > { %1611 = vmatprep.mubr.msk.f32.mxu0 %vm1846_vm1, %v1845_v15 }
  0xbb   : > { %v400_v16 = vpop.permute.xlu0 %399 }
 0x116   : > { %v440_v17 = vpop.f32.mrb[0].mxu0 }
 0x117   : > { %v441_v18 = vadd.f32 %v440_v17, %v400_v16  ;;  %v442_v19 = vpop.f32.mrb[1].mxu0 }
 0x118   : > { %v443_v20 = vadd.f32 %v442_v19, %v400_v16  ;;  %v444_v21 = vpop.f32.mrb[2].mxu0 }
 0x119   : > { %v445_v22 = vpop.f32.mrb[3].mxu0  ;;  %v450_v23 = vmul.f32 %v441_v18, %v441_v18 }
 0x11a   : > { %v447_v24 = vadd.f32 %v443_v20, %v441_v18  ;;  %v451_v25 = vmul.f32 %v443_v20, %v443_v20 }
 0x11c   : > { %448 = vadd.xlane.f32.xlu0 %v447_v24  ;;  %v452_v26 = vadd.f32 %v451_v25, %v450_v23  ;;  %v690_v23 = vld [vmem:[%s2380_s9 + $0x20] sm:$0xff]  ;;  %v691_v24 = vld [vmem:[%s2380_s9 + $0x28] sm:$0xff] }
 0x11e   : > { %453 = vadd.xlane.f32.xlu1 %v452_v26 }
 0x1a9   : > { %v449_v28 = vpop.xlane.xlu0 %448 }
 0x1aa   : > { %1600 = vmatpush3.msra.mxu1 %v449_v28  ;;  %v692_v28 = vld [vmem:[%s2380_s9 + $0x30] sm:$0xff] }
 0x1ab   : > { %v454_v29 = vpop.xlane.xlu1 %453  ;;  %1602 = vmatmul.mubr.msk.f32.vlgmr.msra.gmra.mrb[0].mxu1 %vm456_vm2, %v2069_v27  ;;  %1604 = vmatprep.subr.mxu1 %v1845_v15 }
 0x1ac   : > { %1605 = vmatpush3.msra.mxu1 %v454_v29  ;;  %1606 = vmatprep.mubr.msk.f32.mxu1 %vm1846_vm1, %v1845_v15  ;;  %v693_v29 = vld [vmem:[%s2380_s9 + $0x38] sm:$0xff] }
 0x1af   : > { %1607 = vmatmul.mubr.msk.f32.vlgmr.msra.gmra.mrb[2].mxu1 %vm456_vm2, %v2069_v27 }
 0x1b0   : > { %786 = vmatprep.mubr.bf16.mxu1 %v1844_v0 }
 0x27e   : > { %v526_v30 = vpop.f32.mrb[0].mxu1 }
 0x27f   : > { %606 = vperm.xlu1 %1728, %v526_v30   ;;  %v1603_v31 = vpop.f32.mrb[1].mxu1  ;;  %v600_v32 = vmul.f32 %v526_v30, %v526_v30 }
 0x282   : > { %v596_v33 = vpop.f32.mrb[2].mxu1 }
 0x283   : > { %v601_v34 = vsub.f32 %v596_v33, %v600_v32  ;;  %v1608_v35 = vpop.f32.mrb[3].mxu1 }
 0x285   : > { %v602_v36 = vadd.f32 1e-05, %v601_v34 }
 0x287   : > { %1731 = vrsqrt.f32 %v602_v36 }
 0x291   : > { %v1732_v38 = vpop.eup %1731 }
 0x292   : > { %v611_v39 = vmul.f32 %v1732_v38, %v1536_v37  ;;  %v694_v37 = vld [vmem:[%s2380_s9 + $0x40] sm:$0xff]  ;;  %v696_v38 = vld [vmem:[%s2380_s9 + $0x50] sm:$0xff] }
 0x294   : > { %614 = vperm.xlu1 %1728, %v611_v39   ;;  %v697_v39 = vld [vmem:[%s2380_s9 + $0x58] sm:$0xff] }
 0x298   : > { %621 = vperm.xlu1 %1728, %v1537_v40   ;;  %v695_v40 = vld [vmem:[%s2380_s9 + $0x48] sm:$0xff] }
 0x2fe   : > { %v607_v41 = vpop.permute.xlu1 %606 }
 0x2ff   : > { %v609_v43 = vsub.f32 %v441_v18, %v607_v41  ;;  %v610_v44 = vsub.f32 %v443_v20, %v607_v41 }
 0x313   : > { %v615_v42 = vpop.permute.xlu1 %614 }
 0x314   : > { %v617_v45 = vmul.f32 %v615_v42, %v609_v43  ;;  %v618_v47 = vmul.f32 %v615_v42, %v610_v44 }
 0x317   : > { %v622_v46 = vpop.permute.xlu1 %621 }
 0x318   : > { %v624_v48 = vadd.f32 %v622_v46, %v617_v45  ;;  %v625_v49 = vadd.f32 %v622_v46, %v618_v47 }
 0x31a   : > { %v2085_v50 = vmax.f32 %v624_v48, 0.0  ;;  %v2090_v51 = vmax.f32 %v625_v49, 0.0 }
 0x31c   : > { %637 = vrot.lane.b32.xlu0 %v2085_v50, %s1847_s22  ;;  %628 = vrot.lane.b32.xlu1 %v2085_v50, %s1848_s24  ;;  %v712_v47 = vmul.f32 %v694_v37, %v2085_v50 }
 0x320   : > { %658 = vrot.lane.b32.xlu0 %v2085_v50, %s1849_s12  ;;  %630 = vrot.lane.b32.xlu1 %v2090_v51, %s1848_s24 }
 0x324   : > { %665 = vrot.lane.b32.xlu0 %v2085_v50, %s1850_s20  ;;  %639 = vrot.lane.b32.xlu1 %v2090_v51, %s1847_s22 }
 0x328   : > { %672 = vrot.lane.b32.xlu0 %v2085_v50, %s1851_s21  ;;  %644 = vrot.lane.b32.xlu1 %v2085_v50, %s1852_s11 }
 0x32c   : > { %679 = vrot.lane.b32.xlu0 %v2085_v50, %s1853_s30  ;;  %646 = vrot.lane.b32.xlu1 %v2090_v51, %s1852_s11  ;;  %s2324_s11 = scalar_lea.hbm %s2381_s10, %s1574_s28 }
 0x330   : > { %740 = vperm.xlu0 %1727, %v733_v52   ;;  %651 = vrot.lane.b32.xlu1 %v2085_v50, %s1854_s23  ;;  %v713_v52 = vmul.f32 %v695_v40, %v2090_v51  ;;  %v699_v50 = vld [vmem:[%s2380_s9 + $0x68] sm:$0xff] }
 0x334   : > { %653 = vrot.lane.b32.xlu1 %v2090_v51, %s1854_s23 }
 0x338   : > { %660 = vrot.lane.b32.xlu1 %v2090_v51, %s1849_s12 }
 0x33c   : > { %667 = vrot.lane.b32.xlu1 %v2090_v51, %s1850_s20  ;;  %s1777_s20 = sshll.u32 %s1855_s29, 4  ;;  %s1778_s20 = int_to_ptr.vmem [resolvable:$false] %s1777_s20 }
 0x340   : > { %674 = vrot.lane.b32.xlu1 %v2090_v51, %s1851_s21  ;;  %s1779_s21 = scalar_lea.vmem %s1778_s20, 2048 }
 0x344   : > { %681 = vrot.lane.b32.xlu1 %v2090_v51, %s1853_s30  ;;  %s377_s30 = scalar_lea.vmem [#allocation5], %s1534_s27 }
 0x345   : > { %s1454_s23 = sshll.u32 %s377_s30, 4  ;;  %s2326_s23 = int_to_ptr.vmem [resolvable:$true] %s1454_s23 }
 0x346   : > { %s1773_s12 = scalar_lea.vmem %s2326_s23, 1024  ;;  %p1780_p8 = scmp.lt.s32.totalorder %s2326_s23, %s1778_s20 }
 0x347   : > { %p1774_p6 = scmp.ne.s32.totalorder %s2326_s23, %s1773_s12  ;;  %p1781_p10 = scmp.lt.s32.totalorder %s1779_s21, %s1773_s12 }
 0x349   : > { %p1775_p12 = pnand %p1774_p6, %p2389_p11  ;;  %p1782_p0 = por %p1781_p10, %p1780_p8 }
 0x34b   : > { %p1776_p13 = pneg %p1775_p12 }
 0x34d   : > { %p1783_p2 = pnand %p1782_p0, %p1776_p13 }
 0x38e   : > { %v629_v54 = vpop.permute.xlu1 %628  ;;  %v638_v63 = vpop.permute.xlu0 %637 }
 0x392   : > { %v631_v56 = vpop.permute.xlu1 %630  ;;  %v659_v22 = vpop.permute.xlu0 %658 }
 0x393   : > { %v635_v59 = vsel %vm634_vm3, %v629_v54, %v631_v56  ;;  %v636_v60 = vsel %vm634_vm3, %v631_v56, %v629_v54 }
 0x394   : > { %v704_v12 = vmul.f32 %v686_v57, %v636_v60  ;;  %v705_v13 = vmul.f32 %v687_v58, %v635_v59  ;;  %v698_v58 = vld [vmem:[%s2380_s9 + $0x60] sm:$0xff]  ;;  %v700_v60 = vld [vmem:[%s2380_s9 + $0x70] sm:$0xff] }
 0x396   : > { %v640_v4 = vpop.permute.xlu1 %639  ;;  %v666_v41 = vpop.permute.xlu0 %665 }
 0x397   : > { %v642_v8 = vsel %vm641_vm4, %v638_v63, %v640_v4  ;;  %v643_v9 = vsel %vm641_vm4, %v640_v4, %v638_v63 }
 0x398   : > { %v706_v14 = vmul.f32 %v688_v61, %v643_v9  ;;  %v707_v16 = vmul.f32 %v689_v62, %v642_v8  ;;  %v701_v61 = vld [vmem:[%s2380_s9 + $0x78] sm:$0xff] }
 0x39a   : > { %v723_v17 = vpack.c.bf16 %v706_v14, %v704_v12  ;;  %v645_v18 = vpop.permute.xlu1 %644  ;;  %v724_v19 = vpack.c.bf16 %v707_v16, %v705_v13  ;;  %v673_v57 = vpop.permute.xlu0 %672  ;;  %v702_v14 = vld [vmem:[%s2380_s9 + $0x80] sm:$0xff]  ;;  %v703_v16 = vld [vmem:[%s2380_s9 + $0x88] sm:$0xff] }
 0x39c   : > { %754 = vmatprep.subr.bf16.mxu1 %v724_v19 }
 0x39d   : > { %755 = vmatpush1.bf16.msra.mxu1 %v723_v17 }
 0x39e   : > { %v647_v20 = vpop.permute.xlu1 %646  ;;  %v680_v17 = vpop.permute.xlu0 %679 }
 0x39f   : > { %v649_v25 = vsel %vm648_vm5, %v645_v18, %v647_v20  ;;  %v650_v26 = vsel %vm648_vm5, %v647_v20, %v645_v18 }
 0x3a0   : > { %v708_v33 = vmul.f32 %v690_v23, %v650_v26  ;;  %v709_v34 = vmul.f32 %v691_v24, %v649_v25 }
 0x3a2   : > { %v652_v21 = vpop.permute.xlu1 %651 }
 0x3a6   : > { %v654_v30 = vpop.permute.xlu1 %653 }
 0x3a7   : > { %v656_v31 = vsel %vm655_vm6, %v652_v21, %v654_v30  ;;  %v657_v32 = vsel %vm655_vm6, %v654_v30, %v652_v21 }
 0x3a8   : > { %v710_v35 = vmul.f32 %v692_v28, %v657_v32  ;;  %v711_v36 = vmul.f32 %v693_v29, %v656_v31  ;;  %v722_v28 = vld [vmem:[%s2373_s2] sm:$0xf] }
 0x3aa   : > { %v725_v42 = vpack.c.bf16 %v710_v35, %v708_v33  ;;  %v661_v43 = vpop.permute.xlu1 %660  ;;  %v726_v44 = vpack.c.bf16 %v711_v36, %v709_v34 }
 0x3ab   : > { %v663_v45 = vsel %vm662_vm7, %v659_v22, %v661_v43  ;;  %v664_v46 = vsel %vm662_vm7, %v661_v43, %v659_v22 }
 0x3ac   : > { %v714_v48 = vmul.f32 %v696_v38, %v663_v45  ;;  %v715_v49 = vmul.f32 %v697_v39, %v664_v46  ;;  %756 = vmatprep.subr.bf16.mxu1 %v726_v44  ;;  %v977_v44 = vld [vmem:[%s2377_s6] sm:$0xff] }
 0x3ad   : > { %757 = vmatpush1.bf16.msra.mxu1 %v725_v42 }
 0x3ae   : > { %v727_v53 = vpack.c.bf16 %v714_v48, %v712_v47  ;;  %v668_v54 = vpop.permute.xlu1 %667  ;;  %v728_v56 = vpack.c.bf16 %v715_v49, %v713_v52 }
 0x3af   : > { %v670_v59 = vsel %vm669_vm8, %v666_v41, %v668_v54  ;;  %v671_v51 = vsel %vm669_vm8, %v668_v54, %v666_v41  ;;  %v741_v29 = vpop.permute.xlu0 %740  ;;  %v1542_v54 = vld [vmem:[%s2376_s5 + $0x10] sm:$0xff] }
 0x3b0   : > { %758 = vmatprep.subr.bf16.mxu1 %v728_v56  ;;  %v716_v8 = vmul.f32 %v698_v58, %v670_v59  ;;  %v717_v9 = vmul.f32 %v699_v50, %v671_v51  ;;  %v978_v56 = vld [vmem:[%s2377_s6 + $0x8] sm:$0xff] }
 0x3b1   : > { %759 = vmatpush1.bf16.msra.mxu1 %v727_v53 }
 0x3b2   : > { %v675_v62 = vpop.permute.xlu1 %674 }
 0x3b3   : > { %v677_v63 = vsel %vm676_vm9, %v673_v57, %v675_v62  ;;  %v678_v4 = vsel %vm676_vm9, %v675_v62, %v673_v57  ;;  %v980_v57 = vld [vmem:[%s2377_s6 + $0x18] sm:$0xff] }
 0x3b4   : > { %v718_v12 = vmul.f32 %v700_v60, %v677_v63  ;;  %v719_v13 = vmul.f32 %v701_v61, %v678_v4 }
 0x3b6   : > { %v729_v18 = vpack.c.bf16 %v718_v12, %v716_v8  ;;  %v682_v19 = vpop.permute.xlu1 %681  ;;  %v730_v20 = vpack.c.bf16 %v719_v13, %v717_v9 }
 0x3b7   : > { %v684_v21 = vsel %vm683_vm10, %v680_v17, %v682_v19  ;;  %v685_v22 = vsel %vm683_vm10, %v682_v19, %v680_v17  ;;  %v1730_v17 = vld [vmem:[%s2374_s3 + $0x8] sm:$0xff]  }
 0x3b8   : > { %v720_v23 = vmul.f32 %v702_v14, %v684_v21  ;;  %v721_v55 = vmul.f32 %v703_v16, %v685_v22  ;;  %760 = vmatprep.subr.bf16.mxu1 %v730_v20  ;;  %v1729_v16 = vld [vmem:[%s2374_s3] sm:$0xff]  }
 0x3b9   : > { %761 = vmatpush1.bf16.msra.mxu1 %v729_v18 }
 0x3ba   : > { %v731_v24 = vpack.c.bf16 %v720_v23, %v720_v23  ;;  %v732_v25 = vpack.c.bf16 %v721_v55, %v721_v55 }
 0x3bc   : > { %1543 = vmatprep.subr.msk.bf16.mxu1 %vm747_vm11, %v732_v25  ;;  %v749_v26 = vsel %vm747_vm11, %v731_v24, 0 }
 0x3bd   : > { %763 = vmatpush1.bf16.msra.mxu1 %v749_v26 }
 0x3c0   : > { %1544 = vmatmul.mubr.msk.bf16.vlgmr.msra.gmra.mrb[4].mxu1 %vm743_vm12, %v722_v28 }
 0x493   : > { %v788_v30 = vpop.f32.mrb[4].mxu1 }
 0x494   : > { %v789_v31 = vadd.f32 %v788_v30, %v741_v29  ;;  %v790_v32 = vpop.f32.mrb[5].mxu1 }
 0x495   : > { %v791_v33 = vadd.f32 %v790_v32, %v741_v29  ;;  %v792_v34 = vpop.f32.mrb[6].mxu1 }
 0x496   : > { %v793_v35 = vpop.f32.mrb[7].mxu1  ;;  %v798_v36 = vmul.f32 %v789_v31, %v789_v31 }
 0x497   : > { %v795_v37 = vadd.f32 %v791_v33, %v789_v31  ;;  %v799_v38 = vmul.f32 %v791_v33, %v791_v33 }
 0x499   : > { %796 = vadd.xlane.f32.xlu1 %v795_v37  ;;  %v800_v39 = vadd.f32 %v799_v38, %v798_v36 }
 0x49b   : > { %801 = vadd.xlane.f32.xlu0 %v800_v39 }
 0x526   : > { %v797_v40 = vpop.xlane.xlu1 %796 }
 0x527   : > { %1610 = vmatpush3.msra.mxu0 %v797_v40 }
 0x528   : > { %v802_v41 = vpop.xlane.xlu0 %801  ;;  %1612 = vmatmul.mubr.msk.f32.vlgmr.msra.gmra.mrb[4].mxu0 %vm456_vm2, %v2069_v27  ;;  %1614 = vmatprep.subr.mxu0 %v1845_v15 }
 0x529   : > { %1615 = vmatpush3.msra.mxu0 %v802_v41  ;;  %1616 = vmatprep.mubr.msk.f32.mxu0 %vm1846_vm1, %v1845_v15  ;;  %v979_v15 = vld [vmem:[%s2377_s6 + $0x10] sm:$0xff] }
 0x52c   : > { %1617 = vmatmul.mubr.msk.f32.vlgmr.msra.gmra.mrb[6].mxu0 %vm456_vm2, %v2069_v27  ;;  %v1541_v27 = vld [vmem:[%s2376_s5 + $0x8] sm:$0xff] }
 0x52d   : > { %1065 = vmatprep.mubr.bf16.mxu0 %v1844_v0 }
 0x5fb   : > { %v869_v42 = vpop.f32.mrb[4].mxu0 }
 0x5fc   : > { %949 = vperm.xlu0 %1727, %v869_v42   ;;  %v1613_v43 = vpop.f32.mrb[5].mxu0  ;;  %v943_v45 = vmul.f32 %v869_v42, %v869_v42 }
 0x5ff   : > { %v939_v46 = vpop.f32.mrb[6].mxu0 }
 0x600   : > { %v944_v47 = vsub.f32 %v939_v46, %v943_v45  ;;  %993 = vperm.xlu0 %1727, %v977_v44   ;;  %v1618_v48 = vpop.f32.mrb[7].mxu0 }
 0x602   : > { %v945_v49 = vadd.f32 1e-05, %v944_v47 }
 0x604   : > { %1733 = vrsqrt.f32 %v945_v49  ;;  %1003 = vperm.xlu0 %1727, %v979_v15  }
 0x60e   : > { %v1734_v52 = vpop.eup %1733 }
 0x60f   : > { %v954_v53 = vmul.f32 %v1734_v52, %v1541_v27 }
 0x611   : > { %957 = vperm.xlu1 %1728, %v954_v53   ;;  %v1552_v53 = vld [vmem:[%s2377_s6 + $0x48] sm:$0xff] }
 0x615   : > { %964 = vperm.xlu1 %1728, %v1542_v54   ;;  %v1118_v54 = vld [vmem:[%s2379_s8] sm:$0xff] }
 0x616   : > { %1627 = vmatprep.mubr.msk.f32.mxu1 %vm402_vm0, %v1118_v54 }
 0x619   : > { %998 = vperm.xlu1 %1728, %v978_v56   ;;  %v1551_v56 = vld [vmem:[%s2377_s6 + $0x40] sm:$0xff] }
 0x61d   : > { %1008 = vperm.xlu1 %1728, %v980_v57  }
 0x67b   : > { %v950_v58 = vpop.permute.xlu0 %949 }
 0x67c   : > { %v952_v59 = vsub.f32 %v789_v31, %v950_v58  ;;  %v953_v51 = vsub.f32 %v791_v33, %v950_v58 }
 0x67f   : > { %v994_v18 = vpop.permute.xlu0 %993 }
 0x683   : > { %v1004_v31 = vpop.permute.xlu0 %1003 }
 0x690   : > { %v958_v50 = vpop.permute.xlu1 %957 }
 0x691   : > { %v960_v60 = vmul.f32 %v958_v50, %v952_v59  ;;  %v961_v61 = vmul.f32 %v958_v50, %v953_v51 }
 0x694   : > { %v965_v62 = vpop.permute.xlu1 %964 }
 0x695   : > { %v967_v63 = vadd.f32 %v965_v62, %v960_v60  ;;  %v968_v4 = vadd.f32 %v965_v62, %v961_v61 }
 0x697   : > { %v969_v8 = vmax.f32 %v967_v63, 0.0  ;;  %v970_v9 = vmax.f32 %v968_v4, 0.0  ;;  %v1119_v63 = vld [vmem:[%s2379_s8 + $0x8] sm:$0xff] }
 0x698   : > { %v999_v22 = vpop.permute.xlu1 %998 }
 0x699   : > { %v975_v12 = vpack.c.bf16 %v969_v8, %v969_v8  ;;  %v976_v13 = vpack.c.bf16 %v970_v9, %v970_v9  ;;  %v1120_v8 = vld [vmem:[%s2379_s8 + $0x10] sm:$0xff] }
 0x69b   : > { %1557 = vmatprep.subr.msk.bf16.mxu0 %vm747_vm11, %v976_v13  ;;  %v1028_v14 = vsel %vm747_vm11, %v975_v12, 0 }
 0x69c   : > { %1034 = vmatpush1.bf16.msra.mxu0 %v1028_v14  ;;  %v1009_v38 = vpop.permute.xlu1 %1008  ;;  %v1121_v14 = vld [vmem:[%s2379_s8 + $0x18] sm:$0xff] }
 0x69f   : > { %1558 = vmatmul.mubr.msk.bf16.vlgmr.msra.gmra.mrb[8].mxu0 %vm456_vm2, %v1729_v16 }
 0x6a0   : > { %1075 = vmatprep.mubr.bf16.mxu0 %v1844_v0 }
 0x6a7   : > { %1559 = vmatmul.mubr.msk.bf16.gmra.mrb[12].mxu0 %vm456_vm2, %v1730_v17 }
 0x6a8   : > { %1641 = vmatprep.mubr.msk.f32.mxu0 %vm402_vm0, %v1118_v54 }
 0x772   : > { %v1067_v19 = vpop.f32.mrb[8].mxu0 }
 0x773   : > { %v2218_v20 = vadd.f32 %v1067_v19, %v994_v18  ;;  %v1069_v21 = vpop.f32.mrb[9].mxu0 }
 0x774   : > { %v2220_v23 = vadd.f32 %v1069_v21, %v994_v18  ;;  %v1071_v55 = vpop.f32.mrb[10].mxu0 }
 0x775   : > { %v2222_v24 = vadd.f32 %v1071_v55, %v999_v22  ;;  %v1073_v25 = vpop.f32.mrb[11].mxu0  ;;  %v1098_v29 = vmul.f32 %v2218_v20, %v2218_v20 }
 0x776   : > { %v2224_v26 = vadd.f32 %v1073_v25, %v999_v22  ;;  %v1086_v0 = vadd.f32 %v2220_v23, %v2218_v20  ;;  %v1099_v30 = vmul.f32 %v2220_v23, %v2220_v23 }
 0x777   : > { %v1100_v47 = vmul.f32 %v2222_v24, %v2222_v24 }
 0x778   : > { %1087 = vadd.xlane.f32.xlu0 %v1086_v0  ;;  %v1089_v28 = vadd.f32 %v2224_v26, %v2222_v24  ;;  %v1106_v37 = vadd.f32 %v1099_v30, %v1098_v29  ;;  %v1101_v48 = vmul.f32 %v2224_v26, %v2224_v26 }
 0x77a   : > { %v1077_v32 = vpop.f32.mrb[12].mxu0  ;;  %1090 = vadd.xlane.f32.xlu1 %v1089_v28  ;;  %v1109_v15 = vadd.f32 %v1101_v48, %v1100_v47 }
 0x77b   : > { %v2234_v33 = vadd.f32 %v1077_v32, %v1004_v31  ;;  %v1079_v34 = vpop.f32.mrb[13].mxu0 }
 0x77c   : > { %v2236_v35 = vadd.f32 %v1079_v34, %v1004_v31  ;;  %v1081_v36 = vpop.f32.mrb[14].mxu0 }
 0x77d   : > { %v1083_v39 = vpop.f32.mrb[15].mxu0  ;;  %v1102_v40 = vmul.f32 %v2234_v33, %v2234_v33  ;;  %v2240_v41 = vadd.f32 %v1081_v36, %v1009_v38 }
 0x77e   : > { %v2242_v42 = vadd.f32 %v1083_v39, %v1009_v38  ;;  %1107 = vadd.xlane.f32.xlu1 %v1106_v37  ;;  %v1092_v43 = vadd.f32 %v2236_v35, %v2234_v33  ;;  %v1103_v44 = vmul.f32 %v2236_v35, %v2236_v35 }
 0x77f   : > { %v1104_v49 = vmul.f32 %v2240_v41, %v2240_v41 }
 0x780   : > { %1093 = vadd.xlane.f32.xlu0 %v1092_v43  ;;  %v1112_v45 = vadd.f32 %v1103_v44, %v1102_v40  ;;  %v1095_v46 = vadd.f32 %v2242_v42, %v2240_v41  ;;  %v1105_v27 = vmul.f32 %v2242_v42, %v2242_v42  ;;  %v1548_v43 = vld [vmem:[%s2377_s6 + $0x28] sm:$0xff]  ;;  %v1547_v44 = vld [vmem:[%s2377_s6 + $0x20] sm:$0xff] }
 0x782   : > { %1113 = vadd.xlane.f32.xlu1 %v1112_v45  ;;  %v1115_v52 = vadd.f32 %v1105_v27, %v1104_v49  ;;  %v1550_v49 = vld [vmem:[%s2377_s6 + $0x38] sm:$0xff] }
 0x784   : > { %1096 = vadd.xlane.f32.xlu0 %v1095_v46 }
 0x788   : > { %1110 = vadd.xlane.f32.xlu0 %v1109_v15 }
 0x78c   : > { %1116 = vadd.xlane.f32.xlu0 %v1115_v52  ;;  %v1549_v52 = vld [vmem:[%s2377_s6 + $0x30] sm:$0xff] }
 0x793   : > { %1387 = vperm.xlu1 %1728, %v1552_v53  }
 0x7a2   : > { %1382 = vperm.xlu0 %1727, %v1551_v56   ;;  %v1554_v56 = vld [vmem:[%s2377_s6 + $0x58] sm:$0xff] }
 0x805   : > { %v1088_v57 = vpop.xlane.xlu0 %1087 }
 0x807   : > { %v1091_v58 = vpop.xlane.xlu1 %1090 }
 0x808   : > { %v1647_v50 = vpack.c.bf16 %v1091_v58, %v1088_v57  ;;  %v1553_v57 = vld [vmem:[%s2377_s6 + $0x50] sm:$0xff] }
 0x80a   : > { %1648 = vmatprep.subr.bf16.mxu1 %v1647_v50 }
 0x80b   : > { %1650 = vmatpush3.bf16.msra.mxu1 %v1647_v50  ;;  %v1108_v61 = vpop.xlane.xlu1 %1107 }
 0x80d   : > { %v1094_v59 = vpop.xlane.xlu0 %1093 }
 0x80f   : > { %v1114_v9 = vpop.xlane.xlu1 %1113 }
 0x811   : > { %v1097_v51 = vpop.xlane.xlu0 %1096 }
 0x812   : > { %v1651_v60 = vpack.c.bf16 %v1097_v51, %v1094_v59 }
 0x813   : > { %v1388_v58 = vpop.permute.xlu1 %1387 }
 0x814   : > { %1652 = vmatprep.subr.bf16.mxu1 %v1651_v60 }
 0x815   : > { %1654 = vmatpush3.bf16.msra.mxu1 %v1651_v60  ;;  %v1111_v62 = vpop.xlane.xlu0 %1110 }
 0x816   : > { %v1655_v4 = vpack.c.bf16 %v1111_v62, %v1108_v61 }
 0x818   : > { %1628 = vmatmul.mubr.msk.f32.vlgmr.msra.gmra.mrb[8].mxu1 %vm402_vm0, %v1119_v63  ;;  %1656 = vmatprep.subr.bf16.mxu0 %v1655_v4 }
 0x819   : > { %1663 = vmatprep.subr.bf16.mxu1 %v1655_v4  ;;  %1658 = vmatpush3.bf16.msra.mxu0 %v1655_v4  ;;  %v1117_v12 = vpop.xlane.xlu0 %1116 }
 0x81a   : > { %1665 = vmatpush3.bf16.msra.mxu1 %v1655_v4  ;;  %v1659_v13 = vpack.c.bf16 %v1117_v12, %v1114_v9  ;;  %1630 = vmatprep.mubr.msk.f32.mxu1 %vm402_vm0, %v1120_v8 }
 0x81c   : > { %1660 = vmatprep.subr.bf16.mxu0 %v1659_v13  ;;  %1664 = vmatprep.subr.bf16.mxu1 %v1659_v13 }
 0x81d   : > { %1631 = vmatmul.mubr.msk.f32.gmra.mrb[10].mxu1 %vm402_vm0, %v1121_v14  ;;  %1662 = vmatpush3.bf16.msra.mxu0 %v1659_v13 }
 0x81e   : > { %1666 = vmatpush3.bf16.msra.mxu1 %v1659_v13  ;;  %1644 = vmatprep.mubr.msk.f32.mxu1 %vm402_vm0, %v1120_v8 }
 0x820   : > { %1642 = vmatmul.mubr.msk.f32.vlgmr.msra.gmra.mrb[16].mxu0 %vm402_vm0, %v1119_v63 }
 0x821   : > { %1645 = vmatmul.mubr.msk.f32.vlgmr.msra.gmra.mrb[12].mxu1 %vm402_vm0, %v1121_v14  ;;  %v1383_v51 = vpop.permute.xlu0 %1382 }
 0x8eb   : > { %v1629_v16 = vpop.f32.mrb[8].mxu1 }
 0x8ec   : > { %1327 = vperm.xlu0 %1727, %v1629_v16   ;;  %v1200_v17 = vpop.f32.mrb[9].mxu1  ;;  %v1305_v22 = vmul.f32 %v1629_v16, %v1629_v16 }
 0x8ed   : > { %1322 = vperm.xlu1 %1728, %v1200_v17   ;;  %v1304_v25 = vmul.f32 %v1200_v17, %v1200_v17 }
 0x8f0   : > { %v1632_v18 = vpop.f32.mrb[10].mxu1 }
 0x8f1   : > { %v1307_v19 = vmul.f32 %v1632_v18, %v1632_v18  ;;  %1337 = vperm.xlu1 %1728, %v1632_v18   ;;  %v1210_v21 = vpop.f32.mrb[11].mxu1 }
 0x8f2   : > { %v1306_v55 = vmul.f32 %v1210_v21, %v1210_v21 }
 0x8f3   : > { %v1643_v0 = vpop.f32.mrb[16].mxu0 }
 0x8f4   : > { %v1309_v28 = vsub.f32 %v1643_v0, %v1305_v22  ;;  %v1285_v29 = vpop.f32.mrb[17].mxu0  ;;  %v1646_v30 = vpop.f32.mrb[12].mxu1 }
 0x8f5   : > { %v1308_v31 = vsub.f32 %v1285_v29, %v1304_v25  ;;  %1332 = vperm.xlu1 %1728, %v1210_v21   ;;  %v1311_v32 = vsub.f32 %v1646_v30, %v1307_v19  ;;  %v1295_v34 = vpop.f32.mrb[13].mxu1 }
 0x8f6   : > { %v1313_v36 = vadd.f32 1e-05, %v1309_v28  ;;  %v1310_v37 = vsub.f32 %v1295_v34, %v1306_v55 }
 0x8f7   : > { %v1312_v38 = vadd.f32 1e-05, %v1308_v31  ;;  %v1315_v39 = vadd.f32 1e-05, %v1311_v32 }
 0x8f8   : > { %1735 = vrsqrt.f32 %v1313_v36  ;;  %v1314_v40 = vadd.f32 1e-05, %v1310_v37 }
 0x8f9   : > { %1737 = vrsqrt.f32 %v1312_v38 }
 0x8fa   : > { %1739 = vrsqrt.f32 %v1315_v39 }
 0x8fb   : > { %1741 = vrsqrt.f32 %v1314_v40 }
 0x902   : > { %v1736_v45 = vpop.eup %1735 }
 0x903   : > { %v1738_v46 = vpop.eup %1737  ;;  %v1349_v47 = vmul.f32 %v1736_v45, %v1548_v43 }
 0x904   : > { %v1740_v48 = vpop.eup %1739  ;;  %v1348_v15 = vmul.f32 %v1738_v46, %v1547_v44 }
 0x905   : > { %v1742_v27 = vpop.eup %1741  ;;  %1359 = vperm.xlu1 %1728, %v1349_v47   ;;  %v1351_v53 = vmul.f32 %v1740_v48, %v1550_v49 }
 0x906   : > { %1354 = vperm.xlu0 %1727, %v1348_v15   ;;  %v1350_v54 = vmul.f32 %v1742_v27, %v1549_v52 }
 0x909   : > { %1369 = vperm.xlu1 %1728, %v1351_v53  }
 0x90a   : > { %1364 = vperm.xlu0 %1727, %v1350_v54  }
 0x90d   : > { %1397 = vperm.xlu1 %1728, %v1554_v56  }
 0x90e   : > { %1392 = vperm.xlu0 %1727, %v1553_v57  }
 0x96b   : > { %v1328_v60 = vpop.permute.xlu0 %1327 }
 0x96c   : > { %v1323_v50 = vpop.permute.xlu1 %1322  ;;  %v1342_v62 = vsub.f32 %v2222_v24, %v1328_v60  ;;  %v1343_v63 = vsub.f32 %v2224_v26, %v1328_v60 }
 0x96d   : > { %v1340_v4 = vsub.f32 %v2218_v20, %v1323_v50  ;;  %v1341_v8 = vsub.f32 %v2220_v23, %v1323_v50 }
 0x970   : > { %v1338_v59 = vpop.permute.xlu1 %1337 }
 0x971   : > { %v1346_v25 = vsub.f32 %v2240_v41, %v1338_v59  ;;  %v1347_v24 = vsub.f32 %v2242_v42, %v1338_v59 }
 0x974   : > { %v1333_v61 = vpop.permute.xlu1 %1332 }
 0x975   : > { %v1344_v23 = vsub.f32 %v2234_v33, %v1333_v61  ;;  %v1345_v28 = vsub.f32 %v2236_v35, %v1333_v61 }
 0x984   : > { %v1360_v9 = vpop.permute.xlu1 %1359 }
 0x985   : > { %v1374_v12 = vmul.f32 %v1360_v9, %v1342_v62  ;;  %v1375_v13 = vmul.f32 %v1360_v9, %v1343_v63  ;;  %v1355_v14 = vpop.permute.xlu0 %1354 }
 0x986   : > { %v1372_v16 = vmul.f32 %v1355_v14, %v1340_v4  ;;  %v1373_v17 = vmul.f32 %v1355_v14, %v1341_v8 }
 0x987   : > { %v1402_v18 = vadd.f32 %v1388_v58, %v1374_v12  ;;  %v1403_v19 = vadd.f32 %v1388_v58, %v1375_v13 }
 0x988   : > { %v1400_v21 = vadd.f32 %v1383_v51, %v1372_v16  ;;  %v1401_v22 = vadd.f32 %v1383_v51, %v1373_v17  ;;  %v1370_v55 = vpop.permute.xlu1 %1369 }
 0x989   : > { %v1410_v26 = vmax.f32 %v1402_v18, 0.0  ;;  %v1411_v0 = vmax.f32 %v1403_v19, 0.0  ;;  %v1365_v20 = vpop.permute.xlu0 %1364  ;;  %v1378_v34 = vmul.f32 %v1370_v55, %v1346_v25  ;;  %v1379_v36 = vmul.f32 %v1370_v55, %v1347_v24 }
 0x98a   : > { %v1408_v29 = vmax.f32 %v1400_v21, 0.0  ;;  %v1409_v30 = vmax.f32 %v1401_v22, 0.0  ;;  %v1376_v37 = vmul.f32 %v1365_v20, %v1344_v23  ;;  %v1377_v38 = vmul.f32 %v1365_v20, %v1345_v28 }
 0x98b   : > { %v1418_v31 = vadd.f32 %v1410_v26, %v2037_v5  ;;  %v1419_v32 = vadd.f32 %v1411_v0, %v2031_v2 }
 0x98c   : > { %v1416_v41 = vadd.f32 %v1408_v29, %v2033_v3  ;;  %v1417_v42 = vadd.f32 %v1409_v30, %v2029_v1  ;;  %v1398_v39 = vpop.permute.xlu1 %1397 }
 0x98d   : > { %v1426_v40 = vmax.f32 %v1418_v31, 0.0  ;;  %v1427_v33 = vmax.f32 %v1419_v32, 0.0  ;;  %v1406_v43 = vadd.f32 %v1398_v39, %v1378_v34  ;;  %v1407_v35 = vadd.f32 %v1398_v39, %v1379_v36  ;;  %v1393_v44 = vpop.permute.xlu0 %1392 }
 0x98e   : > { %v1424_v45 = vmax.f32 %v1416_v41, 0.0  ;;  %v1425_v5 = vmax.f32 %v1417_v42, 0.0  ;;  %v1404_v46 = vadd.f32 %v1393_v44, %v1376_v37  ;;  %v1405_v2 = vadd.f32 %v1393_v44, %v1377_v38 }
 0x98f   : > { %1434 = vst [vmem:[%s377_s30 + $0x10] sm:$0xff] %v1426_v40  ;;  %1435 = vst [vmem:[%s377_s30 + $0x18] sm:$0xff] %v1427_v33  ;;  %v1414_v3 = vmax.f32 %v1406_v43, 0.0  ;;  %v1415_v47 = vmax.f32 %v1407_v35, 0.0 }
 0x990   : > { %1432 = vst [vmem:[%s377_s30] sm:$0xff] %v1424_v45  ;;  %1433 = vst [vmem:[%s377_s30 + $0x8] sm:$0xff] %v1425_v5  ;;  %v1412_v1 = vmax.f32 %v1404_v46, 0.0  ;;  %v1413_v48 = vmax.f32 %v1405_v2, 0.0 }
 0x991   : > { %v1422_v15 = vadd.f32 %v1414_v3, %v2049_v11  ;;  %v1423_v49 = vadd.f32 %v1415_v47, %v2041_v7 }
 0x992   : > { %v1420_v27 = vadd.f32 %v1412_v1, %v2047_v10  ;;  %v1421_v52 = vadd.f32 %v1413_v48, %v2039_v6 }
 0x993   : > { %v1430_v53 = vmax.f32 %v1422_v15, 0.0  ;;  %v1431_v54 = vmax.f32 %v1423_v49, 0.0 }
 0x994   : > { %v1428_v56 = vmax.f32 %v1420_v27, 0.0  ;;  %v1429_v57 = vmax.f32 %v1421_v52, 0.0 }
 0x995   : > { %1438 = vst [vmem:[%s377_s30 + $0x30] sm:$0xff] %v1430_v53  ;;  %1439 = vst [vmem:[%s377_s30 + $0x38] sm:$0xff] %v1431_v54 }
 0x996   : > { %1436 = vst [vmem:[%s377_s30 + $0x20] sm:$0xff] %v1428_v56  ;;  %1437 = vst [vmem:[%s377_s30 + $0x28] sm:$0xff] %v1429_v57 }
 0x997   : > { %1786 = shalt.err (!%p1783_p2)
}
 0x998   : > { %s1787_s30 = scalar_lea.hbm %s2324_s11, 1024  ;;  %s1791_s24 = scalar_lea.hbm %s2381_s10, 2048 }
 0x999   : > { %p1788_p4 = scmp.ne.s32.totalorder %s2324_s11, %s1787_s30  ;;  %p1792_p9 = scmp.lt.u32.totalorder %s2324_s11, %s2381_s10 }
 0x99a   : > { %p1793_p1 = scmp.lt.u32.totalorder %s1791_s24, %s1787_s30  ;;  %p1795_p6 = scmp.lt.u32.totalorder %s1787_s30, %s2324_s11 }
 0x99b   : > { %p1789_p5 = pnand %p1788_p4, %p2389_p11 }
 0x99c   : > { %p1794_p3 = por %p1793_p1, %p1792_p9 }
 0x99d   : > { %p1790_p7 = pneg %p1789_p5 }
 0x99e   : > { %p1796_p12 = por %p1795_p6, %p1794_p3 }
 0x9a0   : > { %p1797_p13 = pnand %p1796_p12, %p1790_p7 }
 0x9a2   : > { %1800 = shalt.err (!%p1797_p13)
}
 0x9a3   : > { %s1856_s12 = smov 256  }
 0x9a4   : > { %1669 = dma.vmem_to_hbm [thread:$0]  (%p2389_p11), %s2326_s23, 1024, %s2324_s11, %s1441_s17, %s1856_s12, %s1856_s12, %s1847_s22  }
 0x9a5 PF: > { %s1469_s21 = sand.u32 1, %s1827_s13   ;;  %p2390_p8 = scmp.ne.s32.totalorder %s2387_s26, 0 }
 0x9a6   : > { %p2391_p10 = scmp.ge.s32.totalorder %s1839_s16, 2  ;;  %s1470_s30 = scalar_lea.sflag [#allocation4], %s1469_s21 }
 0x9a8   : > { %p1676_p0 = pnand %p2391_p10, %p2390_p8 }
 0x9aa   : > { %1822 = dma.done.wait (!%p1676_p0), %s1470_s30, 1024  }
 0x9ab   : > { %1824 = vsyncadd (!%p1676_p0), %s1470_s30, 4294966272  ;;  %s2392_s25 = sld [smem:[#allocation8_spill]]  ;;  %p23_p2 = scmp.ge.s32.totalorder %s1937_s19, 4  }
 0x9ac   : > { %s2393_s13 = smov %s1831_s14  ;;  %s2394_s14 = smov %s1835_s15 }
 0x9ad   : > { %s2396_s16 = smov %s1937_s19  ;;  %25 = sbr.rel (!%p23_p2) target bundleno = 5 (0x5), region = 111 }
 0x9b1   : > { %s2395_s15 = smov %s2392_s25 }
 0x9b4   :  { %1475 = vsyncpa [#allocation3], 1 }
 0x9b5   :  { %1477 = vsyncpa [#allocation3 + $0x1], 1 }
 0x9b6   :  { %1478 = vsyncpa [#allocation4], 1 }
 0x9b7   :  { %1480 = vsyncpa [#allocation4 + $0x1], 1 }

</bundles_post_ra>
